<compile_context>
chip_gen: v7x
topology: tpu7x:2x2x1
jax: 0.10.0
libtpu: 0.0.40
codegen_flags: <defaults>
</compile_context>

<pallas_src>
import numpy as np
import jax
import jax.numpy as jnp
from jax import lax
from jax.experimental import pallas as pl
from jax.experimental.pallas import tpu as pltpu


# ----------------------------------------------------------------------------
# Filter construction (mirrors get_parameterized_filter(..., Smooth)).
# The 2D Gaussian is exactly separable: w2d == outer(w1d, w1d).
# ----------------------------------------------------------------------------
def smooth_filter_1d(k: int = 3) -> np.ndarray:
    border = 0.5 * (k - 1.0)
    t = np.linspace(-border, border, k)
    g = np.exp(-0.5 * (t / (0.25 * k)) ** 2)
    return (g / g.sum()).astype(np.float64)


def smooth_filter_2d(k: int = 3) -> np.ndarray:
    # Direct construction exactly as in the PyTorch module (for the reference).
    border = 0.5 * (k - 1.0)
    t = np.linspace(-border, border, k)
    xx, yy = np.meshgrid(t, t)
    r = np.sqrt(xx ** 2 + yy ** 2)
    data = np.exp(-0.5 * (r / (0.25 * k)) ** 2)
    return (data / np.abs(data).sum()).astype(np.float32)


# ----------------------------------------------------------------------------
# Pallas kernel: separable depthwise smoothing on an (nc_blk, H, W) NCHW tile.
# ----------------------------------------------------------------------------
def _make_kernel(k: int, H: int, W: int, pad: int, w1d: np.ndarray):
    w = [float(v) for v in w1d]          # baked-in scalar constants
    half = k // 2

    def kernel(x_ref, o_ref, xpad_ref, ypad_ref):
        # x_ref   : (nc, H,  W )  input block (original dtype)
        # o_ref   : (nc, H,  W )  output block
        # xpad_ref: (nc, Hp, W )  f32 scratch, input zero-padded along H
        # ypad_ref: (nc, H,  Wp)  f32 scratch, vertical result padded along W
        nc = x_ref.shape[0]
        f32 = jnp.float32

        # Build the H-padded input in VMEM (zero halos every step: scratch
        # persists across grid steps / cores, so never gate this on step 0).
        zrow = jnp.zeros((nc, pad, W), f32)
        xpad_ref[:, pl.ds(0, pad), :] = zrow
        xpad_ref[:, pl.ds(pad + H, pad), :] = zrow
        xpad_ref[:, pl.ds(pad, H), :] = x_ref[...].astype(f32)

        # Vertical (H) pass: sublane-offset taps, symmetric folding.
        acc = w[half] * xpad_ref[:, pl.ds(half, H), :]
        for dy in range(half):
            acc = acc + w[dy] * (xpad_ref[:, pl.ds(dy, H), :] +
                                 xpad_ref[:, pl.ds(k - 1 - dy, H), :])

        # W-padded intermediate in VMEM.
        zcol = jnp.zeros((nc, H, pad), f32)
        ypad_ref[:, :, pl.ds(0, pad)] = zcol
        ypad_ref[:, :, pl.ds(pad + W, pad)] = zcol
        ypad_ref[:, :, pl.ds(pad, W)] = acc

        # Horizontal (W) pass: lane-offset taps, symmetric folding.
        out = w[half] * ypad_ref[:, :, pl.ds(half, W)]
        for dx in range(half):
            out = out + w[dx] * (ypad_ref[:, :, pl.ds(dx, W)] +
                                 ypad_ref[:, :, pl.ds(k - 1 - dx, W)])
        o_ref[...] = out.astype(o_ref.dtype)

    return kernel


# ----------------------------------------------------------------------------
# Per-generation VMEM sizing + channel-tile selection.
# ----------------------------------------------------------------------------
def _vmem_budget():
    try:
        cap = int(pltpu.get_tpu_info().vmem_capacity_bytes)
    except Exception:
        cap = 64 * 1024 * 1024           # conservative fallback (v7x-sized)
    vmem_limit = cap * 3 // 4            # ~96 MiB on v5e/v6e, ~48 MiB on v7x
    block_budget = vmem_limit * 3 // 5   # headroom for Mosaic internal scratch
    return vmem_limit, block_budget


def _pick_nc_block(NC, per_nc_bytes, block_budget, target_steps=8):
    """Largest fused-(N*C) tile fitting VMEM, capped so the grid has enough
    steps to pipeline and to feed both v7x TensorCores."""
    by_vmem = max(1, block_budget // max(per_nc_bytes, 1))
    by_steps = max(1, -(-NC // target_steps))          # cdiv(NC, target_steps)
    nc_blk = int(max(1, min(by_vmem, by_steps, NC)))
    # Mild preference for a divisor of NC (avoids a ragged, partially-OOB
    # last block; a ragged last block is still correct since every output
    # row depends only on its own (n, c) slice).
    d = nc_blk
    while d > 1 and NC % d:
        d -= 1
    if d >= max(1, nc_blk // 2):
        nc_blk = d
    return nc_blk


# ----------------------------------------------------------------------------
# Wrapper: equivalent of SmoothConv(k, stride).forward(x) for NCHW input x.
# ----------------------------------------------------------------------------
def smooth_conv(x: jax.Array, k: int = 3, stride: int = 1) -> jax.Array:
    assert k % 2 == 1, "SmoothConv Pallas kernel requires odd k ('same' padding)"
    N, C, H, W = x.shape
    pad = k // 2
    Hp, Wp = H + 2 * pad, W + 2 * pad
    NC = N * C
    w1d = smooth_filter_1d(k)

    # Free reshape (merges contiguous leading dims) -- no transpose, no pad.
    x3 = x.reshape(NC, H, W)

    e = x.dtype.itemsize
    # Per-leading-index VMEM: double-buffered in/out blocks + two f32 scratches.
    per_nc = 2 * H * W * e + 2 * H * W * e + Hp * W * 4 + H * Wp * 4
    vmem_limit, block_budget = _vmem_budget()
    nc_blk = _pick_nc_block(NC, per_nc, block_budget)
    grid = (pl.cdiv(NC, nc_blk),)
    # TODO(synk): for very large spatial dims (per_nc > budget) add an H-tile
    # grid axis with an overlapping halo instead of relying on full-H blocks.

    out3 = pl.pallas_call(
        _make_kernel(k, H, W, pad, w1d),
        out_shape=jax.ShapeDtypeStruct((NC, H, W), x.dtype),
        grid=grid,
        in_specs=[pl.BlockSpec((nc_blk, H, W), lambda i: (i, 0, 0))],
        out_specs=pl.BlockSpec((nc_blk, H, W), lambda i: (i, 0, 0)),
        scratch_shapes=[pltpu.VMEM((nc_blk, Hp, W), jnp.float32),
                        pltpu.VMEM((nc_blk, H, Wp), jnp.float32)],
        compiler_params=pltpu.CompilerParams(
            dimension_semantics=("parallel",),
            vmem_limit_bytes=int(vmem_limit)),
    )(x3)

    out = out3.reshape(N, C, H, W)       # free reshape back
    if stride > 1:
        # TODO(synk): fold stride into the kernel (strided pl.ds reads and a
        # (ceil(H/s), ceil(W/s)) output block) instead of post-hoc subsampling.
        out = out[:, :, ::stride, ::stride]
    return out


# ----------------------------------------------------------------------------
# Pure-JAX reference (depthwise conv, direct 2D filter) for self-check.
# ----------------------------------------------------------------------------
def smooth_conv_ref(x, k=3, stride=1):
    C = x.shape[1]
    w_full = jnp.broadcast_to(jnp.asarray(smooth_filter_2d(k)), (C, 1, k, k))
    return lax.conv_general_dilated(
        x, w_full, (stride, stride), [(k // 2, k // 2)] * 2,
        dimension_numbers=("NCHW", "OIHW", "NCHW"),
        feature_group_count=C,
        precision=lax.Precision.HIGHEST)


if __name__ == "__main__":
    key = jax.random.PRNGKey(0)
    x = jax.random.normal(key, (2, 4, 16, 16), dtype=jnp.float32)

    # Primary check: k=3, stride=1 (the module defaults).
    out = smooth_conv(x, k=3, stride=1)
    jax.block_until_ready(out)
    np.testing.assert_allclose(np.asarray(out),
                               np.asarray(smooth_conv_ref(x, k=3, stride=1)),
                               rtol=1e-5, atol=1e-5)

    # Larger odd kernel.
    out5 = smooth_conv(x, k=5, stride=1)
    jax.block_until_ready(out5)
    np.testing.assert_allclose(np.asarray(out5),
                               np.asarray(smooth_conv_ref(x, k=5, stride=1)),
                               rtol=1e-5, atol=1e-5)

    # Strided variant.
    out_s = smooth_conv(x, k=3, stride=2)
    jax.block_until_ready(out_s)
    np.testing.assert_allclose(np.asarray(out_s),
                               np.asarray(smooth_conv_ref(x, k=3, stride=2)),
                               rtol=1e-5, atol=1e-5)

    print("KERNEL_OK")
</pallas_src>

<mosaic_0001>
module attributes {stable_mosaic.version = 11 : i64} {
  func.func @kernel(%arg0: i32, %arg1: memref<1x16x16xf32, #tpu.memory_space<vmem>>, %arg2: memref<1x16x16xf32, #tpu.memory_space<vmem>>, %arg3: memref<1x18x16xf32, #tpu.memory_space<vmem>>, %arg4: memref<1x16x18xf32, #tpu.memory_space<vmem>>) attributes {dimension_semantics = [#tpu.dimension_semantics<parallel>], iteration_bounds = array<i64: 8>, scalar_prefetch = 0 : i64, scratch_operands = 2 : i64, tpu.core_type = #tpu.core_type<tc>, window_params = [{transform_indices = @transform_0, window_bounds = array<i64: 1, 16, 16>}, {transform_indices = @transform_1, window_bounds = array<i64: 1, 16, 16>}]} {
    %cst = arith.constant 0.000000e+00 : f32
    %0 = vector.broadcast %cst : f32 to vector<1x1x16xf32>
    %c0 = arith.constant 0 : index
    %c0_0 = arith.constant 0 : index
    %c0_1 = arith.constant 0 : index
    %1 = vector.load %arg3[%c0, %c0_0, %c0_1] : memref<1x18x16xf32, #tpu.memory_space<vmem>>, vector<1x1x16xf32>
    tpu.vector_store %arg3[%c0, %c0_0, %c0_1], %0 {strides = array<i32>} : memref<1x18x16xf32, #tpu.memory_space<vmem>>, vector<1x1x16xf32>,
    %c0_2 = arith.constant 0 : index
    %c17 = arith.constant 17 : index
    %c0_3 = arith.constant 0 : index
    %2 = vector.load %arg3[%c0_2, %c17, %c0_3] : memref<1x18x16xf32, #tpu.memory_space<vmem>>, vector<1x1x16xf32>
    tpu.vector_store %arg3[%c0_2, %c17, %c0_3], %0 {strides = array<i32>} : memref<1x18x16xf32, #tpu.memory_space<vmem>>, vector<1x1x16xf32>,
    %c0_4 = arith.constant 0 : index
    %c0_5 = arith.constant 0 : index
    %c0_6 = arith.constant 0 : index
    %3 = vector.load %arg1[%c0_4, %c0_5, %c0_6] : memref<1x16x16xf32, #tpu.memory_space<vmem>>, vector<1x16x16xf32>
    %c0_7 = arith.constant 0 : index
    %c1 = arith.constant 1 : index
    %c0_8 = arith.constant 0 : index
    %4 = vector.load %arg3[%c0_7, %c1, %c0_8] : memref<1x18x16xf32, #tpu.memory_space<vmem>>, vector<1x16x16xf32>
    tpu.vector_store %arg3[%c0_7, %c1, %c0_8], %3 {strides = array<i32>} : memref<1x18x16xf32, #tpu.memory_space<vmem>>, vector<1x16x16xf32>,
    %c0_9 = arith.constant 0 : index
    %c1_10 = arith.constant 1 : index
    %c0_11 = arith.constant 0 : index
    %5 = vector.load %arg3[%c0_9, %c1_10, %c0_11] : memref<1x18x16xf32, #tpu.memory_space<vmem>>, vector<1x16x16xf32>
    %cst_12 = arith.constant 0.548779786 : f32
    %6 = vector.broadcast %cst_12 : f32 to vector<1x16x16xf32>
    %7 = arith.mulf %6, %5 : vector<1x16x16xf32>
    %c0_13 = arith.constant 0 : index
    %c0_14 = arith.constant 0 : index
    %c0_15 = arith.constant 0 : index
    %8 = vector.load %arg3[%c0_13, %c0_14, %c0_15] : memref<1x18x16xf32, #tpu.memory_space<vmem>>, vector<1x16x16xf32>
    %c0_16 = arith.constant 0 : index
    %c2 = arith.constant 2 : index
    %c0_17 = arith.constant 0 : index
    %9 = vector.load %arg3[%c0_16, %c2, %c0_17] : memref<1x18x16xf32, #tpu.memory_space<vmem>>, vector<1x16x16xf32>
    %10 = arith.addf %8, %9 : vector<1x16x16xf32>
    %cst_18 = arith.constant 0.225610107 : f32
    %11 = vector.broadcast %cst_18 : f32 to vector<1x16x16xf32>
    %12 = arith.mulf %11, %10 : vector<1x16x16xf32>
    %13 = arith.addf %7, %12 : vector<1x16x16xf32>
    %cst_19 = arith.constant 0.000000e+00 : f32
    %14 = vector.broadcast %cst_19 : f32 to vector<1x16x1xf32>
    %c0_20 = arith.constant 0 : index
    %c0_21 = arith.constant 0 : index
    %c0_22 = arith.constant 0 : index
    %15 = vector.load %arg4[%c0_20, %c0_21, %c0_22] : memref<1x16x18xf32, #tpu.memory_space<vmem>>, vector<1x16x1xf32>
    tpu.vector_store %arg4[%c0_20, %c0_21, %c0_22], %14 {strides = array<i32>} : memref<1x16x18xf32, #tpu.memory_space<vmem>>, vector<1x16x1xf32>,
    %c0_23 = arith.constant 0 : index
    %c0_24 = arith.constant 0 : index
    %c17_25 = arith.constant 17 : index
    %16 = vector.load %arg4[%c0_23, %c0_24, %c17_25] : memref<1x16x18xf32, #tpu.memory_space<vmem>>, vector<1x16x1xf32>
    tpu.vector_store %arg4[%c0_23, %c0_24, %c17_25], %14 {strides = array<i32>} : memref<1x16x18xf32, #tpu.memory_space<vmem>>, vector<1x16x1xf32>,
    %c0_26 = arith.constant 0 : index
    %c0_27 = arith.constant 0 : index
    %c1_28 = arith.constant 1 : index
    %17 = vector.load %arg4[%c0_26, %c0_27, %c1_28] : memref<1x16x18xf32, #tpu.memory_space<vmem>>, vector<1x16x16xf32>
    tpu.vector_store %arg4[%c0_26, %c0_27, %c1_28], %13 {strides = array<i32>} : memref<1x16x18xf32, #tpu.memory_space<vmem>>, vector<1x16x16xf32>,
    %c0_29 = arith.constant 0 : index
    %c0_30 = arith.constant 0 : index
    %c1_31 = arith.constant 1 : index
    %18 = vector.load %arg4[%c0_29, %c0_30, %c1_31] : memref<1x16x18xf32, #tpu.memory_space<vmem>>, vector<1x16x16xf32>
    %cst_32 = arith.constant 0.548779786 : f32
    %19 = vector.broadcast %cst_32 : f32 to vector<1x16x16xf32>
    %20 = arith.mulf %19, %18 : vector<1x16x16xf32>
    %c0_33 = arith.constant 0 : index
    %c0_34 = arith.constant 0 : index
    %c0_35 = arith.constant 0 : index
    %21 = vector.load %arg4[%c0_33, %c0_34, %c0_35] : memref<1x16x18xf32, #tpu.memory_space<vmem>>, vector<1x16x16xf32>
    %c0_36 = arith.constant 0 : index
    %c0_37 = arith.constant 0 : index
    %c2_38 = arith.constant 2 : index
    %22 = vector.load %arg4[%c0_36, %c0_37, %c2_38] : memref<1x16x18xf32, #tpu.memory_space<vmem>>, vector<1x16x16xf32>
    %23 = arith.addf %21, %22 : vector<1x16x16xf32>
    %cst_39 = arith.constant 0.225610107 : f32
    %24 = vector.broadcast %cst_39 : f32 to vector<1x16x16xf32>
    %25 = arith.mulf %24, %23 : vector<1x16x16xf32>
    %26 = arith.addf %20, %25 : vector<1x16x16xf32>
    %c0_40 = arith.constant 0 : index
    %c0_41 = arith.constant 0 : index
    %c0_42 = arith.constant 0 : index
    %27 = vector.load %arg2[%c0_40, %c0_41, %c0_42] : memref<1x16x16xf32, #tpu.memory_space<vmem>>, vector<1x16x16xf32>
    tpu.vector_store %arg2[%c0_40, %c0_41, %c0_42], %26 {strides = array<i32>} : memref<1x16x16xf32, #tpu.memory_space<vmem>>, vector<1x16x16xf32>,
    return
  }
  func.func @transform_0(%arg0: i32) -> (i32, i32, i32) {
    %c0_i32 = arith.constant 0 : i32
    %c0_i32_0 = arith.constant 0 : i32
    %c0_i32_1 = arith.constant 0 : i32
    return %arg0, %c0_i32, %c0_i32_0 : i32, i32, i32
  }
  func.func @transform_1(%arg0: i32) -> (i32, i32, i32) {
    %c0_i32 = arith.constant 0 : i32
    %c0_i32_0 = arith.constant 0 : i32
    %c0_i32_1 = arith.constant 0 : i32
    return %arg0, %c0_i32, %c0_i32_0 : i32, i32, i32
  }
}

</mosaic_0001>

<bundles_post_ra>
// kernel: tpu_custom_call.1
= control target key start
LH: loop header
LB: loop body
LE: loop exit
PB: predicated region body
PF: predicated region fallthrough
CT: control target
= control target key end

     0   :  { %6 = vsyncpa [#allocation5], 0  ;;  %s653_s0 = inlined_call_operand.hbm [shape: f32[8,16,16], index: 0, kind: input, shape index: {}]   ;;  %s654_s1 = inlined_call_operand.hbm [shape: f32[8,16,16], index: 1, kind: output, shape index: {}]  }
   0x1   :  { %8 = vsyncpa [#allocation5 + $0x1], 0 }
   0x2   :  { %9 = vsyncpa [#allocation6], 0 }
   0x3   :  { %11 = vsyncpa [#allocation6 + $0x1], 0  ;;  %s485_s6 = smov 0   ;;  %s487_s7 = smov 0  }
   0x4   :  { %s489_s8 = smov 0   ;;  %s491_s9 = smov 0  }
   0x5 LB: > { %s506_s10 = sadd.s32 4294967295, %s463_s9   ;;  %s297_s11 = sadd.s32 4294967294, %s463_s9   ;;  %s463_s9 = sphi %s491_s9, %s666_s9   ;;  %s459_s8 = sphi %s489_s8, %s665_s8   ;;  %s455_s7 = sphi %s487_s7, %s664_s7   ;;  %s451_s6 = sphi %s485_s6, %s663_s6  }
   0x6   : > { %s510_s12 = sadd.s32 1, %s463_s9   ;;  %s24_s13 = sadd.s32 1, %s459_s8 }
   0x7   : > { %s21_s14 = ssub.s32 %s463_s9, %s510_s12  ;;  %p31_p0 = scmp.ne.s32.totalorder %s459_s8, %s455_s7 }
   0x8   : > { %p22_p1 = scmp.eq.s32.totalorder %s21_s14, 0  ;;  %p32_p2 = scmp.eq.s32.totalorder %s463_s9, 0 }
   0x9   : > { %p37_p3 = scmp.ne.s32.totalorder %s455_s7, %s451_s6  ;;  %p38_p4 = scmp.eq.s32.totalorder %s506_s10, 0 }
   0xa   : > { %s522_s15 = scalar_select %p22_p1, %s459_s8, %s24_s13  }
   0xb   : > { %p524_p5 = por %p32_p2, %p31_p0  ;;  %p528_p6 = por %p38_p4, %p37_p3 }
   0xc   : > { %p61_p7 = scmp.eq.s32.totalorder %s506_s10, 7  ;;  %p67_p8 = scmp.eq.s32.totalorder %s297_s11, 7 }
   0xd   : > { %p325_p9 = scmp.lt.s32.totalorder %s463_s9, 8  ;;  %s87_s20 = sand.u32 1, %s459_s8  }
   0xe   : > { %p534_p10 = por %p61_p7, %p31_p0  ;;  %p538_p11 = por %p67_p8, %p37_p3 }
   0xf   : > { %s311_s21 = sshll.u32 %s463_s9, 8  ;;  %s300_s22 = sshll.u32 %s87_s20, 4 }
  0x10   : > { %s658_s18 = scalar_select %p534_p10, 1, 0 }
  0x11   : > { %s659_s19 = scalar_select %p538_p11, 1, 0 }
  0x12   : > { %s547_s25 = scalar_lea.hbm %s653_s0, %s311_s21  ;;  %s91_s26 = scalar_lea.vmem [#allocation4], %s300_s22 }
  0x13   : > { %s98_s27 = sshll.u32 %s91_s26, 4  ;;  %p551_p12 = pnand %p325_p9, %p524_p5  ;;  %s555_s27 = int_to_ptr.vmem [resolvable:$true] %s98_s27 }
  0x14   : > { %s557_s29 = scalar_lea.sflag [#allocation5], %s87_s20  ;;  %s367_s30 = scalar_lea.hbm %s547_s25, 256 }
  0x15   : > { %p368_p13 = scmp.ne.s32.totalorder %s547_s25, %s367_s30  ;;  %p369_p0 = pneg %p551_p12 }
  0x16   : > { %s372_s4 = scalar_lea.hbm %s653_s0, 2048  ;;  %p373_p3 = scmp.lt.u32.totalorder %s547_s25, %s653_s0 }
  0x17   : > { %p370_p1 = pnand %p369_p0, %p368_p13  ;;  %p374_p4 = scmp.lt.u32.totalorder %s372_s4, %s367_s30 }
  0x18   : > { %p376_p7 = scmp.lt.u32.totalorder %s367_s30, %s547_s25 }
  0x19   : > { %p371_p2 = pneg %p370_p1  ;;  %p375_p5 = por %p374_p4, %p373_p3 }
  0x1b   : > { %p377_p8 = por %p376_p7, %p375_p5 }
  0x1d   : > { %p378_p9 = pnand %p377_p8, %p371_p2 }
  0x1f   : > { %381 = shalt.err (!%p378_p9)
}
  0x20   : > { %s382_s13 = scalar_lea.vmem %s555_s27, 256  ;;  %s465_s14 = smov [#allocation4]  }
  0x21   : > { %p383_p13 = scmp.ne.s32.totalorder %s555_s27, %s382_s13  ;;  %s387_s16 = sshll.u32 %s465_s14, 4  ;;  %s388_s16 = int_to_ptr.vmem [resolvable:$false] %s387_s16 }
  0x22   : > { %s389_s20 = scalar_lea.vmem %s388_s16, 512  ;;  %p390_p10 = scmp.lt.s32.totalorder %s555_s27, %s388_s16 }
  0x23   : > { %p385_p1 = pnand %p383_p13, %p369_p0  ;;  %p391_p3 = scmp.lt.s32.totalorder %s389_s20, %s382_s13 }
  0x25   : > { %p386_p11 = pneg %p385_p1  ;;  %p392_p4 = por %p391_p3, %p390_p10 }
  0x27   : > { %p393_p5 = pnand %p392_p4, %p386_p11 }
  0x29   : > { %396 = shalt.err (!%p393_p5)
}
  0x2a   : > { %s466_s21 = smov 128   ;;  %s467_s22 = smov 8  }
  0x2b   : > { %320 = dma.hbm_to_vmem [thread:$0]  (!%p551_p12), %s547_s25, 256, %s555_s27, %s557_s29, %s466_s21, %s466_s21, %s467_s22  }
  0x2c   : > { %p303_p0 = scmp.ge.s32.totalorder %s463_s9, 1  ;;  %p106_p2 = scmp.lt.s32.totalorder %s463_s9, 9 }
  0x2e   : > { %p107_p7 = pnand %p303_p0, %p106_p2 }
  0x2f   : > { %s588_s23 = sand.u32 (!%p107_p7), 1, %s455_s7  }
  0x30   : > { %110 = sbr.rel (%p107_p7) target bundleno = 569 (0x239), region = 24  ;;  %s304_s24 = sshll.u32 (!%p107_p7), %s588_s23, 4 }
  0x31   : > { %s113_s26 = scalar_lea.sflag (!%p107_p7), [#allocation5], %s588_s23  ;;  %s116_s30 = scalar_lea.vmem (!%p107_p7), [#allocation4], %s304_s24 }
  0x37   : > { %442 = dma.done.wait (%p528_p6), %s113_s26, 256  }
  0x38   : > { %444 = vsyncadd (%p528_p6), %s113_s26, 4294967040  ;;  %vm135_vm0 = vcmask 122880   ;;  %vm157_vm1 = vcmask 7168   ;;  %v468_v0 = vmov 0.0   ;;  %vm160_vm2 = vcmask 146568   ;;  %v138_v1 = vld [vmem:[%s116_s30] sm:$0xff] }
  0x39   : > { %136 = vst.msk [vmem:[#allocation2] sm:$0x1] %vm135_vm0, %v468_v0  ;;  %137 = vst.msk [vmem:[#allocation2 + $0x11] sm:$0x1] %vm135_vm0, %v468_v0  ;;  %vm140_vm3 = vcmask 130048   ;;  %v139_v2 = vld [vmem:[%s116_s30 + $0x8] sm:$0xff] }
  0x3a   : > { %158 = vst.msk [vmem:[#allocation3] sm:$0xff] %vm157_vm1, %v468_v0  ;;  %159 = vst.msk [vmem:[#allocation3 + $0x8] sm:$0xff] %vm157_vm1, %v468_v0  ;;  %s469_s17 = smov 1   ;;  %vm171_vm4 = vcmask 138248   ;;  %s470_s25 = smov 126  }
  0x3b   : > { %161 = vst.msk [vmem:[#allocation3] sm:$0xff] %vm160_vm2, %v468_v0  ;;  %162 = vst.msk [vmem:[#allocation3 + $0x8] sm:$0xff] %vm160_vm2, %v468_v0  ;;  %s471_s27 = smov 127   ;;  %s134_s28 = scalar_lea.vmem [#allocation7], %s304_s24 }
  0x3c   : > { %141 = vst.msk [vmem:[#allocation2 + $0x1] sm:$0xff] %vm140_vm3, %v138_v1  ;;  %142 = vst.msk [vmem:[#allocation2 + $0x9] sm:$0xff] %vm140_vm3, %v139_v2  ;;  %s224_s29 = sshll.u32 %s134_s28, 4  ;;  %s312_s2 = sshll.u32 %s506_s10, 8  ;;  %s603_s29 = int_to_ptr.vmem [resolvable:$true] %s224_s29 }
  0x3d   : > { %s609_s5 = scalar_lea.hbm %s654_s1, %s312_s2  ;;  %s211_s11 = scalar_lea.sflag [#allocation6], %s588_s23 }
  0x3e   : > { %s397_s13 = scalar_lea.vmem %s603_s29, 256  ;;  %p661_p10 = scmp.ne.s32.totalorder %s658_s18, 0 }
  0x3f   : > { %p398_p6 = scmp.ne.s32.totalorder %s603_s29, %s397_s13  ;;  %s472_s10 = smov [#allocation7]  }
  0x40   : > { %s401_s14 = sshll.u32 %s472_s10, 4  ;;  %s402_s14 = int_to_ptr.vmem [resolvable:$false] %s401_s14 }
  0x41   : > { %p399_p11 = pnand %p398_p6, %p661_p10  ;;  %s403_s16 = scalar_lea.vmem %s402_s14, 512 }
  0x42   : > { %p404_p8 = scmp.lt.s32.totalorder %s603_s29, %s402_s14  ;;  %p405_p9 = scmp.lt.s32.totalorder %s403_s16, %s397_s13 }
  0x43   : > { %v143_v3 = vld [vmem:[#allocation2 + $0x1] sm:$0xff]  ;;  %v144_v8 = vld [vmem:[#allocation2 + $0x9] sm:$0xff]  ;;  %p400_p12 = pneg %p399_p11 }
  0x44   : > { %v147_v4 = vld [vmem:[#allocation2] sm:$0xff]  ;;  %v145_v6 = vmul.f32 0.5487798, %v143_v3  ;;  %v148_v9 = vld [vmem:[#allocation2 + $0x8] sm:$0xff]  ;;  %v146_v13 = vmul.f32 0.5487798, %v144_v8  ;;  %p406_p13 = por %p405_p9, %p404_p8 }
  0x45   : > { %v149_v5 = vld [vmem:[#allocation2 + $0x2] sm:$0xff]  ;;  %v150_v10 = vld [vmem:[#allocation2 + $0xa] sm:$0xff] }
  0x46   : > { %v151_v7 = vadd.f32 %v149_v5, %v147_v4  ;;  %v152_v11 = vadd.f32 %v150_v10, %v148_v9  ;;  %p407_p1 = pnand %p406_p13, %p400_p12 }
  0x48   : > { %v153_v12 = vmul.f32 0.2256101, %v151_v7  ;;  %v154_v14 = vmul.f32 0.2256101, %v152_v11 }
  0x4a   : > { %v155_v15 = vadd.f32 %v153_v12, %v145_v6  ;;  %v156_v16 = vadd.f32 %v154_v14, %v146_v13 }
  0x4c   : > { %165 = vrot.lane.b32.xlu0 %v155_v15, %s469_s17 }
  0x50   : > { %167 = vrot.lane.b32.xlu0 %v156_v16, %s469_s17 }
  0xbe   : > { %v166_v17 = vpop.permute.xlu0 %165 }
  0xbf   : > { %172 = vst.msk [vmem:[#allocation3] sm:$0xff] %vm171_vm4, %v166_v17 }
  0xc2   : > { %v168_v18 = vpop.permute.xlu0 %167 }
  0xc3   : > { %173 = vst.msk [vmem:[#allocation3 + $0x8] sm:$0xff] %vm171_vm4, %v168_v18 }
  0xc6   : > { %v174_v19 = vld [vmem:[#allocation3] sm:$0xff] }
  0xc7   : > { %180 = vrot.lane.b32.xlu1 %v174_v19, %s470_s25  ;;  %v176_v27 = vmul.f32 0.5487798, %v174_v19 }
  0xca   : > { %v175_v20 = vld [vmem:[#allocation3 + $0x8] sm:$0xff] }
  0xcb   : > { %182 = vrot.lane.b32.xlu1 %v175_v20, %s470_s25  ;;  %v177_v30 = vmul.f32 0.5487798, %v175_v20 }
 0x139   : > { %v181_v21 = vpop.permute.xlu1 %180 }
 0x13a   : > { %v186_v22 = vadd.f32 %v181_v21, %v174_v19 }
 0x13c   : > { %v188_v23 = vmul.f32 0.2256101, %v186_v22 }
 0x13d   : > { %v183_v24 = vpop.permute.xlu1 %182 }
 0x13e   : > { %v187_v25 = vadd.f32 %v183_v24, %v175_v20  ;;  %192 = vrot.lane.b32.xlu0 %v188_v23, %s469_s17 }
 0x140   : > { %v189_v26 = vmul.f32 0.2256101, %v187_v25 }
 0x142   : > { %194 = vrot.lane.b32.xlu1 %v189_v26, %s469_s17 }
 0x1b0   : > { %v193_v28 = vpop.permute.xlu0 %192 }
 0x1b1   : > { %v198_v29 = vadd.f32 %v193_v28, %v176_v27 }
 0x1b3   : > { %202 = vrot.lane.b32.xlu0 %v198_v29, %s471_s27 }
 0x1b4   : > { %v195_v31 = vpop.permute.xlu1 %194 }
 0x1b5   : > { %v199_v32 = vadd.f32 %v195_v31, %v177_v30 }
 0x1b7   : > { %204 = vrot.lane.b32.xlu1 %v199_v32, %s471_s27 }
 0x225   : > { %v203_v33 = vpop.permute.xlu0 %202 }
 0x226   : > { %208 = vst.msk [vmem:[%s134_s28] sm:$0xff] %vm140_vm3, %v203_v33 }
 0x229   : > { %v205_v34 = vpop.permute.xlu1 %204 }
 0x22a   : > { %209 = vst.msk [vmem:[%s134_s28 + $0x8] sm:$0xff] %vm140_vm3, %v205_v34 }
 0x22b   : > { %410 = shalt.err (!%p407_p1)
}
 0x22c   : > { %s411_s20 = scalar_lea.hbm %s609_s5, 256  ;;  %s415_s24 = scalar_lea.hbm %s654_s1, 2048 }
 0x22d   : > { %p412_p3 = scmp.ne.s32.totalorder %s609_s5, %s411_s20  ;;  %p416_p0 = scmp.lt.u32.totalorder %s609_s5, %s654_s1 }
 0x22e   : > { %p417_p2 = scmp.lt.u32.totalorder %s415_s24, %s411_s20  ;;  %p419_p6 = scmp.lt.u32.totalorder %s411_s20, %s609_s5 }
 0x22f   : > { %p413_p4 = pnand %p412_p3, %p661_p10 }
 0x230   : > { %p418_p7 = por %p417_p2, %p416_p0 }
 0x231   : > { %p414_p5 = pneg %p413_p4 }
 0x232   : > { %p420_p11 = por %p419_p6, %p418_p7 }
 0x234   : > { %p421_p12 = pnand %p420_p11, %p414_p5 }
 0x236   : > { %424 = shalt.err (!%p421_p12)
}
 0x237   : > { %s473_s17 = smov 128   ;;  %s474_s25 = smov 8  }
 0x238   : > { %315 = dma.vmem_to_hbm [thread:$0]  (%p661_p10), %s603_s29, 256, %s609_s5, %s211_s11, %s473_s17, %s473_s17, %s474_s25  }
 0x239 PF: > { %p326_p8 = scmp.ge.s32.totalorder %s463_s9, 2  ;;  %s239_s27 = sand.u32 1, %s451_s6  }
 0x23a   : > { %p662_p9 = scmp.ne.s32.totalorder %s659_s19, 0  ;;  %s240_s28 = scalar_lea.sflag [#allocation6], %s239_s27 }
 0x23c   : > { %p322_p13 = pnand %p326_p8, %p662_p9 }
 0x23e   : > { %446 = dma.done.wait (!%p322_p13), %s240_s28, 256  }
 0x23f   : > { %448 = vsyncadd (!%p322_p13), %s240_s28, 4294967040  ;;  %p14_p1 = scmp.ge.s32.totalorder %s510_s12, 10   ;;  %s663_s6 = smov %s455_s7 }
 0x240   : > { %s664_s7 = smov %s459_s8  ;;  %s665_s8 = smov %s522_s15 }
 0x241   : > { %s666_s9 = smov %s510_s12  ;;  %16 = sbr.rel (!%p14_p1) target bundleno = 5 (0x5), region = 69 }
 0x248   :  { %245 = vsyncpa [#allocation5], 1 }
 0x249   :  { %247 = vsyncpa [#allocation5 + $0x1], 1 }
 0x24a   :  { %248 = vsyncpa [#allocation6], 1 }
 0x24b   :  { %250 = vsyncpa [#allocation6 + $0x1], 1 }

</bundles_post_ra>
